<compile_context>
chip_gen: v7x
topology: tpu7x:2x2x1
jax: 0.10.0
libtpu: 0.0.40
codegen_flags: <defaults>
</compile_context>

<pallas_src>
import jax
import jax.numpy as jnp
from jax.experimental import pallas as pl
from jax.experimental.pallas import tpu as pltpu

F32 = jnp.float32
_LANE = 128


# --------------------------------------------------------------------------------------
# Fused kernel (one grid step = Bt batch elements, all resident in VMEM):
#   x_ref     : (Bt, C,  HWp)  input pixels, channels on sublanes, spatial on lanes
#   wv_w_ref  : (Ch, C)        sp_wv 1x1-conv weight      wv_b_ref : (Ch, 1) bias
#   wq_wt_ref : (C,  Ch)       sp_wq 1x1-conv weight, pre-transposed
#   wq_bt_ref : (1,  Ch)       sp_wq bias (row)
#   o_ref     : (Bt, C,  HWp)  output
# --------------------------------------------------------------------------------------
def _make_kernel(batch_tile: int, inv_hw: float):
    def kernel(x_ref, wv_w_ref, wv_b_ref, wq_wt_ref, wq_bt_ref, o_ref):
        wv_w = wv_w_ref[...]            # (Ch, C)
        wv_b = wv_b_ref[...]            # (Ch, 1)
        wq_wt = wq_wt_ref[...]          # (C, Ch)
        wq_bt = wq_bt_ref[...]          # (1, Ch)

        # Static unrolled loop over the batch tile (batch_tile is small, <= 8).
        for b in range(batch_tile):
            xb = x_ref[b]                                                      # (C, HWp)

            # spatial_wv = sp_wv(x): (Ch, C) @ (C, HWp) + b  -> MXU, lane-dense.
            wv = jnp.dot(wv_w, xb, preferred_element_type=jnp.float32) + wv_b  # (Ch, HWp)

            # AdaptiveAvgPool folded through the affine 1x1 conv (exact):
            # mean over REAL pixels (zero padding contributes nothing to the sum).
            x_mean = jnp.sum(xb, axis=1, keepdims=True) * inv_hw               # (C, 1)

            # pooled spatial_wq on VPU + XLU (no lane-sparse N=1 MXU matvec):
            wq_avg = jnp.sum(wq_wt * x_mean, axis=0, keepdims=True) + wq_bt    # (1, Ch)

            # spatial_wz = spatial_wq @ spatial_wv : lane-dense MXU matvec.
            wz = jnp.dot(wq_avg, wv, preferred_element_type=jnp.float32)       # (1, HWp)

            # sigmoid on EUP, reweight on VPU, lane-dense store.
            o_ref[b] = xb * jax.nn.sigmoid(wz)

    return kernel


def spatial_only_branch(x_bchw, wv_w, wv_b, wq_w, wq_b):
    """Forward pass of Spatial_only_branch.

    x_bchw : (B, C, H, W) f32
    wv_w   : (C//2, C)  sp_wv 1x1 conv weight (squeezed from (C//2, C, 1, 1))
    wv_b   : (C//2,)    sp_wv bias
    wq_w   : (C//2, C)  sp_wq 1x1 conv weight
    wq_b   : (C//2,)    sp_wq bias
    returns (B, C, H, W) f32
    """
    B, C, H, W = x_bchw.shape
    HW = H * W
    Ch = wv_w.shape[0]
    assert Ch == C // 2, "weight shape must be (C//2, C)"

    # --- lane-density guard: pad spatial dim to a multiple of 128 ---------------------
    HWp = ((HW + _LANE - 1) // _LANE) * _LANE
    x = x_bchw.reshape(B, C, HW).astype(F32)
    if HWp != HW:
        x = jnp.pad(x, ((0, 0), (0, 0), (0, HWp - HW)))

    # --- batch tile: big enough to amortize per-step overhead, small enough for VMEM --
    per_batch_bytes = C * HWp * 4
    target_tile_bytes = 2 << 20                                  # ~2 MiB x-tile target
    bt = int(max(1, min(8, target_tile_bytes // max(per_batch_bytes, 1))))
    if B >= 2:
        bt = min(bt, B // 2)                                     # keep >= 2 grid steps (v7x: 2 TCs)
    bt = max(1, bt)
    while B % bt:                                                # bt must divide B
        bt -= 1
    grid = (B // bt,)

    # --- parameter layouts ------------------------------------------------------------
    wv_w_f = wv_w.astype(F32)                                    # (Ch, C)
    wv_b2 = wv_b.reshape(Ch, 1).astype(F32)                      # (Ch, 1)
    wq_wt = wq_w.T.astype(F32)                                   # (C, Ch) pre-transposed
    wq_bt = wq_b.reshape(1, Ch).astype(F32)                      # (1, Ch)

    # --- VMEM budget: double-buffered in+out tiles + weights ---------------------------
    tile_bytes = bt * per_batch_bytes
    weight_bytes = (Ch * C * 2 + Ch * 2) * 4
    vmem_needed = 4 * tile_bytes + 2 * weight_bytes + (1 << 20)  # 2 bufs x (in+out) + slack
    cp_kwargs = dict(dimension_semantics=("parallel",))
    if vmem_needed > (30 << 20):                                 # only raise when required
        cp_kwargs["vmem_limit_bytes"] = int(min(vmem_needed, 100 << 20))
    compiler_params = pltpu.CompilerParams(**cp_kwargs)

    cost = pl.CostEstimate(
        flops=int(2 * B * Ch * C * HWp + 2 * B * Ch * HWp + 2 * B * C * Ch),
        transcendentals=int(B * HWp),
        bytes_accessed=int(2 * B * C * HWp * 4 + weight_bytes),
    )

    kernel = _make_kernel(bt, 1.0 / float(HW))

    out = pl.pallas_call(
        kernel,
        out_shape=jax.ShapeDtypeStruct((B, C, HWp), F32),
        grid=grid,
        in_specs=[
            pl.BlockSpec((bt, C, HWp), lambda i: (i, 0, 0)),     # x   (batch-tiled)
            pl.BlockSpec((Ch, C), lambda i: (0, 0)),             # wv weight
            pl.BlockSpec((Ch, 1), lambda i: (0, 0)),             # wv bias
            pl.BlockSpec((C, Ch), lambda i: (0, 0)),             # wq weight (transposed)
            pl.BlockSpec((1, Ch), lambda i: (0, 0)),             # wq bias (row)
        ],
        out_specs=pl.BlockSpec((bt, C, HWp), lambda i: (i, 0, 0)),
        compiler_params=compiler_params,
        cost_estimate=cost,
    )(x, wv_w_f, wv_b2, wq_wt, wq_bt)

    if HWp != HW:
        out = out[:, :, :HW]
    return out.reshape(B, C, H, W)


# --------------------------------------------------------------------------------------
# Pure-JAX reference mirroring the PyTorch forward literally (conv -> pool -> matmul).
# --------------------------------------------------------------------------------------
def spatial_only_branch_ref(x, wv_w, wv_b, wq_w, wq_b):
    B, C, H, W = x.shape
    xf = x.reshape(B, C, H * W)
    wv = jnp.einsum("oc,bcp->bop", wv_w, xf) + wv_b[None, :, None]       # (B, C//2, HW)
    wq = jnp.einsum("oc,bcp->bop", wq_w, xf) + wq_b[None, :, None]       # (B, C//2, HW)
    wq = jnp.mean(wq, axis=2)                                            # agp -> (B, C//2)
    wz = jnp.einsum("bo,bop->bp", wq, wv)                                # (B, HW)
    weight = jax.nn.sigmoid(wz).reshape(B, 1, H, W)
    return weight * x


# --------------------------------------------------------------------------------------
if __name__ == "__main__":
    B, C, H, W = 2, 64, 16, 16          # small shapes; H*W = 256 keeps lanes dense
    Ch = C // 2

    root = jax.random.PRNGKey(0)
    kx, k1, k2, k3, k4 = jax.random.split(root, 5)

    bound = 1.0 / (C ** 0.5)            # PyTorch Conv2d default init scale
    x = jax.random.normal(kx, (B, C, H, W), F32)
    wv_w = jax.random.uniform(k1, (Ch, C), F32, -bound, bound)
    wv_b = jax.random.uniform(k2, (Ch,), F32, -bound, bound)
    wq_w = jax.random.uniform(k3, (Ch, C), F32, -bound, bound)
    wq_b = jax.random.uniform(k4, (Ch,), F32, -bound, bound)

    fwd = jax.jit(spatial_only_branch)
    y = jax.block_until_ready(fwd(x, wv_w, wv_b, wq_w, wq_b))

    assert y.shape == (B, C, H, W)
    assert bool(jnp.all(jnp.isfinite(y)))

    y_ref = spatial_only_branch_ref(x, wv_w, wv_b, wq_w, wq_b)
    assert bool(jnp.allclose(y, y_ref, rtol=1e-4, atol=1e-4)), "mismatch vs reference"

    print("KERNEL_OK")
</pallas_src>

<mosaic_0001>
module attributes {stable_mosaic.version = 11 : i64} {
  func.func @kernel(%arg0: i32, %arg1: memref<1x64x256xf32, #tpu.memory_space<vmem>>, %arg2: memref<32x64xf32, #tpu.memory_space<vmem>>, %arg3: memref<32x1xf32, #tpu.memory_space<vmem>>, %arg4: memref<64x32xf32, #tpu.memory_space<vmem>>, %arg5: memref<1x32xf32, #tpu.memory_space<vmem>>, %arg6: memref<1x64x256xf32, #tpu.memory_space<vmem>>) attributes {dimension_semantics = [#tpu.dimension_semantics<parallel>], iteration_bounds = array<i64: 2>, scalar_prefetch = 0 : i64, scratch_operands = 0 : i64, tpu.core_type = #tpu.core_type<tc>, window_params = [{transform_indices = @transform_0, window_bounds = array<i64: 1, 64, 256>}, {pipeline_mode = #tpu.pipeline_mode<synchronous>, transform_indices = @transform_1, window_bounds = array<i64: 32, 64>}, {pipeline_mode = #tpu.pipeline_mode<synchronous>, transform_indices = @transform_2, window_bounds = array<i64: 32, 1>}, {pipeline_mode = #tpu.pipeline_mode<synchronous>, transform_indices = @transform_3, window_bounds = array<i64: 64, 32>}, {pipeline_mode = #tpu.pipeline_mode<synchronous>, transform_indices = @transform_4, window_bounds = array<i64: 1, 32>}, {transform_indices = @transform_5, window_bounds = array<i64: 1, 64, 256>}]} {
    %c0 = arith.constant 0 : index
    %c0_0 = arith.constant 0 : index
    %0 = vector.load %arg2[%c0, %c0_0] : memref<32x64xf32, #tpu.memory_space<vmem>>, vector<32x64xf32>
    %c0_1 = arith.constant 0 : index
    %c0_2 = arith.constant 0 : index
    %1 = vector.load %arg3[%c0_1, %c0_2] : memref<32x1xf32, #tpu.memory_space<vmem>>, vector<32x1xf32>
    %c0_3 = arith.constant 0 : index
    %c0_4 = arith.constant 0 : index
    %2 = vector.load %arg4[%c0_3, %c0_4] : memref<64x32xf32, #tpu.memory_space<vmem>>, vector<64x32xf32>
    %c0_5 = arith.constant 0 : index
    %c0_6 = arith.constant 0 : index
    %3 = vector.load %arg5[%c0_5, %c0_6] : memref<1x32xf32, #tpu.memory_space<vmem>>, vector<1x32xf32>
    %c0_7 = arith.constant 0 : index
    %c0_8 = arith.constant 0 : index
    %c0_9 = arith.constant 0 : index
    %4 = vector.load %arg1[%c0_7, %c0_8, %c0_9] : memref<1x64x256xf32, #tpu.memory_space<vmem>>, vector<1x64x256xf32>
    %5 = vector.shape_cast %4 : vector<1x64x256xf32> to vector<64x256xf32>
    %cst = arith.constant dense<0.000000e+00> : vector<32x256xf32>
    %6 = tpu.matmul %0, %5, %cst {dimension_numbers = #tpu.dot_dimension_numbers<[1], [0], [0], [1], [0, 0, 1, 1], [], []>} : vector<32x64xf32>, vector<64x256xf32>, vector<32x256xf32> -> vector<32x256xf32>
    %7 = vector.broadcast %1 : vector<32x1xf32> to vector<32x256xf32>
    %8 = arith.addf %6, %7 : vector<32x256xf32>
    %cst_10 = arith.constant dense<0.000000e+00> : vector<64xf32>
    %9 = vector.multi_reduction <add>, %5, %cst_10 [1] : vector<64x256xf32> to vector<64xf32>
    %10 = vector.shape_cast %9 : vector<64xf32> to vector<64x1xf32>
    %cst_11 = arith.constant 3.906250e-03 : f32
    %11 = vector.broadcast %cst_11 : f32 to vector<64x1xf32>
    %12 = arith.mulf %10, %11 : vector<64x1xf32>
    %13 = vector.broadcast %12 : vector<64x1xf32> to vector<64x32xf32>
    %14 = arith.mulf %2, %13 : vector<64x32xf32>
    %cst_12 = arith.constant dense<0.000000e+00> : vector<32xf32>
    %15 = vector.multi_reduction <add>, %14, %cst_12 [0] : vector<64x32xf32> to vector<32xf32>
    %16 = vector.shape_cast %15 : vector<32xf32> to vector<1x32xf32>
    %17 = arith.addf %16, %3 : vector<1x32xf32>
    %cst_13 = arith.constant dense<0.000000e+00> : vector<1x256xf32>
    %18 = tpu.matmul %17, %8, %cst_13 {dimension_numbers = #tpu.dot_dimension_numbers<[1], [0], [0], [1], [0, 0, 1, 1], [], []>} : vector<1x32xf32>, vector<32x256xf32>, vector<1x256xf32> -> vector<1x256xf32>
    %19 = arith.negf %18 : vector<1x256xf32>
    %20 = math.exp %19 : vector<1x256xf32>
    %cst_14 = arith.constant 1.000000e+00 : f32
    %21 = vector.broadcast %cst_14 : f32 to vector<1x256xf32>
    %22 = arith.addf %21, %20 : vector<1x256xf32>
    %23 = arith.divf %21, %22 : vector<1x256xf32>
    %24 = vector.broadcast %23 : vector<1x256xf32> to vector<64x256xf32>
    %25 = arith.mulf %5, %24 : vector<64x256xf32>
    %c0_15 = arith.constant 0 : index
    %c0_16 = arith.constant 0 : index
    %c0_17 = arith.constant 0 : index
    %26 = vector.load %arg6[%c0_15, %c0_16, %c0_17] : memref<1x64x256xf32, #tpu.memory_space<vmem>>, vector<1x64x256xf32>
    %27 = vector.shape_cast %26 : vector<1x64x256xf32> to vector<64x256xf32>
    %28 = vector.shape_cast %25 : vector<64x256xf32> to vector<1x64x256xf32>
    tpu.vector_store %arg6[%c0_15, %c0_16, %c0_17], %28 {strides = array<i32>} : memref<1x64x256xf32, #tpu.memory_space<vmem>>, vector<1x64x256xf32>,
    return
  }
  func.func @transform_0(%arg0: i32) -> (i32, i32, i32) {
    %c0_i32 = arith.constant 0 : i32
    %c0_i32_0 = arith.constant 0 : i32
    %c0_i32_1 = arith.constant 0 : i32
    return %arg0, %c0_i32, %c0_i32_0 : i32, i32, i32
  }
  func.func @transform_1(%arg0: i32) -> (i32, i32) {
    %c0_i32 = arith.constant 0 : i32
    %c0_i32_0 = arith.constant 0 : i32
    %c0_i32_1 = arith.constant 0 : i32
    return %c0_i32, %c0_i32_0 : i32, i32
  }
  func.func @transform_2(%arg0: i32) -> (i32, i32) {
    %c0_i32 = arith.constant 0 : i32
    %c0_i32_0 = arith.constant 0 : i32
    %c0_i32_1 = arith.constant 0 : i32
    return %c0_i32, %c0_i32_0 : i32, i32
  }
  func.func @transform_3(%arg0: i32) -> (i32, i32) {
    %c0_i32 = arith.constant 0 : i32
    %c0_i32_0 = arith.constant 0 : i32
    %c0_i32_1 = arith.constant 0 : i32
    return %c0_i32, %c0_i32_0 : i32, i32
  }
  func.func @transform_4(%arg0: i32) -> (i32, i32) {
    %c0_i32 = arith.constant 0 : i32
    %c0_i32_0 = arith.constant 0 : i32
    %c0_i32_1 = arith.constant 0 : i32
    return %c0_i32, %c0_i32_0 : i32, i32
  }
  func.func @transform_5(%arg0: i32) -> (i32, i32, i32) {
    %c0_i32 = arith.constant 0 : i32
    %c0_i32_0 = arith.constant 0 : i32
    %c0_i32_1 = arith.constant 0 : i32
    return %arg0, %c0_i32, %c0_i32_0 : i32, i32, i32
  }
}

</mosaic_0001>

<bundles_post_ra>
// kernel: spatial_only_branch.1
= control target key start
LH: loop header
LB: loop body
LE: loop exit
PB: predicated region body
PF: predicated region fallthrough
CT: control target
= control target key end

     0   :  { %s728_s18 = smov 0   ;;  %s933_s0 = inlined_call_operand.vmem [shape: f32[2,64,256], index: 0, kind: input, shape index: {}]   ;;  %s934_s1 = inlined_call_operand.vmem [shape: f32[32,64], index: 1, kind: input, shape index: {}]   ;;  %s935_s2 = inlined_call_operand.vmem [shape: f32[32,1], index: 2, kind: input, shape index: {}]   ;;  %s936_s3 = inlined_call_operand.vmem [shape: f32[64,32], index: 3, kind: input, shape index: {}]   ;;  %s937_s4 = inlined_call_operand.vmem [shape: f32[1,32], index: 4, kind: input, shape index: {}]   ;;  %s938_s5 = inlined_call_operand.vmem [shape: f32[2,64,256], index: 5, kind: output, shape index: {}]  }
   0x1 LB: > { %s624_s19 = sadd.s32 4294967295, %s694_s18   ;;  %p628_p0 = scmp.ge.s32.totalorder %s694_s18, 1  ;;  %s694_s18 = sphi %s728_s18, %s15_s18  }
   0x2   : > { %p187_p1 = scmp.lt.s32.totalorder %s694_s18, 3 }
   0x4   : > { %p188_p2 = pnand %p628_p0, %p187_p1 }
   0x5   : > { %p215_p3 = scmp.lt.s32.totalorder (!%p188_p2), %s624_s19, 1  ;;  %v696_v0 = vmov (!%p188_p2), 0.0   ;;  %v697_v1 = vmov (!%p188_p2), 0   ;;  %v225_v34 = vld [vmem:[%s934_s1] sm:$0xff] (!%p188_p2)  ;;  %vm278_vm0 = vcmask (!%p188_p2), 523264   ;;  %v226_v35 = vld [vmem:[%s934_s1 + $0x8] sm:$0xff] (!%p188_p2) }
   0x6   : > { %191 = sbr.rel (%p188_p2) target bundleno = 518 (0x206), region = 40  ;;  %355 = vmatprep.mubr.f32.mxu0 (!%p188_p2), %v696_v0  ;;  %510 = vmatprep.mubr.f32.mxu1 (!%p188_p2), %v696_v0  ;;  %v227_v36 = vld [vmem:[%s934_s1 + $0x10] sm:$0xff] (!%p188_p2)  ;;  %v228_v37 = vld [vmem:[%s934_s1 + $0x18] sm:$0xff] (!%p188_p2)  ;;  %v230_v38 = vld [vmem:[%s935_s2 + $0x8] sm:$0xff] (!%p188_p2)  ;;  %vm420_vm1 = vcmask (!%p188_p2), 261120  }
   0x7   : > { %679 = vset.pattern.permute.xlu1 (!%p188_p2), %v697_v1  ;;  %678 = vset.pattern.permute.xlu0 (!%p188_p2), %v697_v1  ;;  %v229_v39 = vld [vmem:[%s935_s2] sm:$0xff] (!%p188_p2)  ;;  %v231_v40 = vld [vmem:[%s935_s2 + $0x10] sm:$0xff] (!%p188_p2)  ;;  %v232_v41 = vld [vmem:[%s935_s2 + $0x18] sm:$0xff] (!%p188_p2) }
   0x8   : > { %v233_v47 = vld [vmem:[%s936_s3] sm:$0xff] (!%p188_p2)  ;;  %v234_v48 = vld [vmem:[%s936_s3 + $0x8] sm:$0xff] (!%p188_p2)  ;;  %v235_v52 = vld [vmem:[%s936_s3 + $0x10] sm:$0xff] (!%p188_p2) }
   0x9   : > { %v236_v58 = vld [vmem:[%s936_s3 + $0x18] sm:$0xff] (!%p188_p2) }
   0xd   : > { %s940_s19 = smov (!%p215_p3, %s624_s19), 1 }
   0xe   : > { %s642_s20 = sshll.u32 %s940_s19, 7 }
   0xf   : > { %s746_s23 = scalar_lea.vmem %s933_s0, %s642_s20  ;;  %s896_s13 = scalar_lea.vmem %s938_s5, %s642_s20 }
  0x10   : > { %v749_v2 = vld [vmem:[%s746_s23 + $0x8] sm:$0xff]  ;;  %v752_v3 = vld [vmem:[%s746_s23 + $0x18] sm:$0xff]  ;;  %v755_v4 = vld [vmem:[%s746_s23] sm:$0xff] }
  0x11   : > { %v644_v5 = vpack.c.bf16 %v752_v3, %v749_v2  ;;  %v760_v6 = vld [vmem:[%s746_s23 + $0x10] sm:$0xff]  ;;  %v763_v7 = vld [vmem:[%s746_s23 + $0x28] sm:$0xff]  ;;  %v766_v8 = vld [vmem:[%s746_s23 + $0x38] sm:$0xff]  ;;  %v380_v9 = vadd.f32 %v749_v2, %v755_v4 }
  0x12   : > { %v646_v10 = vpack.c.bf16 %v760_v6, %v755_v4  ;;  %v648_v11 = vpack.c.bf16 %v766_v8, %v763_v7  ;;  %v775_v12 = vld [vmem:[%s746_s23 + $0x20] sm:$0xff]  ;;  %v778_v13 = vld [vmem:[%s746_s23 + $0x30] sm:$0xff]  ;;  %v781_v14 = vld [vmem:[%s746_s23 + $0x48] sm:$0xff]  ;;  %v383_v17 = vadd.f32 %v752_v3, %v760_v6 }
  0x13   : > { %645 = vmatprep.subr.bf16.mxu0 %v644_v5  ;;  %v784_v15 = vld [vmem:[%s746_s23 + $0x58] sm:$0xff]  ;;  %381 = vadd.xlane.f32.xlu0 %v380_v9  ;;  %v386_v16 = vadd.f32 %v763_v7, %v775_v12  ;;  %v650_v18 = vpack.c.bf16 %v778_v13, %v775_v12  ;;  %v795_v20 = vld [vmem:[%s746_s23 + $0x40] sm:$0xff]  ;;  %v798_v21 = vld [vmem:[%s746_s23 + $0x50] sm:$0xff]  ;;  %v389_v22 = vadd.f32 %v766_v8, %v778_v13 }
  0x14   : > { %647 = vmatpush1.bf16.msra.mxu0 %v646_v10  ;;  %v652_v19 = vpack.c.bf16 %v784_v15, %v781_v14  ;;  %v803_v23 = vld [vmem:[%s746_s23 + $0x68] sm:$0xff]  ;;  %v806_v24 = vld [vmem:[%s746_s23 + $0x78] sm:$0xff]  ;;  %v392_v25 = vadd.f32 %v781_v14, %v795_v20  ;;  %v654_v26 = vpack.c.bf16 %v798_v21, %v795_v20  ;;  %v815_v28 = vld [vmem:[%s746_s23 + $0x60] sm:$0xff]  ;;  %v395_v30 = vadd.f32 %v784_v15, %v798_v21 }
  0x15   : > { %649 = vmatprep.subr.bf16.mxu0 %v648_v11  ;;  %387 = vadd.xlane.f32.xlu1 %v386_v16  ;;  %v656_v27 = vpack.c.bf16 %v806_v24, %v803_v23  ;;  %v818_v29 = vld [vmem:[%s746_s23 + $0x70] sm:$0xff]  ;;  %v398_v31 = vadd.f32 %v803_v23, %v815_v28  ;;  %v238_v16 = vld [vmem:[%s936_s3 + $0x28] sm:$0xff] }
  0x16   : > { %v658_v32 = vpack.c.bf16 %v818_v29, %v815_v28  ;;  %v401_v33 = vadd.f32 %v806_v24, %v818_v29 }
  0x17   : > { %384 = vadd.xlane.f32.xlu0 %v383_v17 }
  0x18   : > { %651 = vmatpush1.bf16.msra.mxu0 %v650_v18 }
  0x19   : > { %653 = vmatprep.subr.bf16.mxu0 %v652_v19  ;;  %390 = vadd.xlane.f32.xlu1 %v389_v22 }
  0x1b   : > { %393 = vadd.xlane.f32.xlu0 %v392_v25 }
  0x1c   : > { %655 = vmatpush1.bf16.msra.mxu0 %v654_v26  ;;  %v239_v26 = vld [vmem:[%s936_s3 + $0x30] sm:$0xff] }
  0x1d   : > { %657 = vmatprep.subr.bf16.mxu0 %v656_v27  ;;  %396 = vadd.xlane.f32.xlu1 %v395_v30 }
  0x1f   : > { %399 = vadd.xlane.f32.xlu0 %v398_v31 }
  0x20   : > { %659 = vmatpush1.bf16.msra.mxu0 %v658_v32 }
  0x21   : > { %402 = vadd.xlane.f32.xlu1 %v401_v33 }
  0x23   : > { %633 = vmatmul.mubr.msk.f32.vlgmr.msra.gmra.mrb[0].mxu0 %vm278_vm0, %v225_v34  ;;  %v240_v34 = vld [vmem:[%s936_s3 + $0x38] sm:$0xff] }
  0x24   : > { %361 = vmatprep.mubr.f32.mxu0 %v696_v0 }
  0x27   : > { %634 = vmatmul.mubr.msk.f32.gmra.mrb[2].mxu0 %vm278_vm0, %v226_v35 }
  0x28   : > { %367 = vmatprep.mubr.f32.mxu0 %v696_v0 }
  0x2b   : > { %635 = vmatmul.mubr.msk.f32.gmra.mrb[4].mxu0 %vm278_vm0, %v227_v36 }
  0x2c   : > { %373 = vmatprep.mubr.f32.mxu0 %v696_v0  ;;  %v237_v0 = vld [vmem:[%s936_s3 + $0x20] sm:$0xff] }
  0x2f   : > { %636 = vmatmul.mubr.msk.f32.gmra.mrb[6].mxu0 %vm278_vm0, %v228_v37 }
  0x32   : > { %265 = vperm.xlu1 %679, %v230_v38  }
  0x35   : > { %260 = vperm.xlu0 %678, %v229_v39  }
  0x36   : > { %270 = vperm.xlu1 %679, %v231_v40  }
  0x3a   : > { %275 = vperm.xlu1 %679, %v232_v41  }
  0xa0   : > { %v382_v42 = vpop.xlane.xlu0 %381 }
  0xa1   : > { %v404_v45 = vmul.f32 0.00390625, %v382_v42 }
  0xa2   : > { %v388_v44 = vpop.xlane.xlu1 %387 }
  0xa3   : > { %v412_v49 = vmul.f32 %v404_v45, %v233_v47  ;;  %v406_v50 = vmul.f32 0.00390625, %v388_v44 }
  0xa4   : > { %v385_v43 = vpop.xlane.xlu0 %384 }
  0xa5   : > { %v405_v46 = vmul.f32 0.00390625, %v385_v43  ;;  %v421_v54 = vsel %vm420_vm1, %v412_v49, 0.0  ;;  %v414_v55 = vmul.f32 %v406_v50, %v235_v52 }
  0xa6   : > { %v391_v53 = vpop.xlane.xlu1 %390 }
  0xa7   : > { %v413_v51 = vmul.f32 %v405_v46, %v234_v48  ;;  %v407_v57 = vmul.f32 0.00390625, %v391_v53  ;;  %v424_v61 = vsel %vm420_vm1, %v414_v55, 0.0 }
  0xa8   : > { %v394_v59 = vpop.xlane.xlu0 %393 }
  0xa9   : > { %v422_v56 = vsel %vm420_vm1, %v413_v51, 0.0  ;;  %v415_v62 = vmul.f32 %v407_v57, %v236_v58  ;;  %v408_v63 = vmul.f32 0.00390625, %v394_v59 }
  0xaa   : > { %v423_v60 = vadd.f32 %v422_v56, %v421_v54  ;;  %v397_v1 = vpop.xlane.xlu1 %396 }
  0xab   : > { %v426_v9 = vsel %vm420_vm1, %v415_v62, 0.0  ;;  %v416_v10 = vmul.f32 %v408_v63, %v237_v0  ;;  %v409_v11 = vmul.f32 0.00390625, %v397_v1 }
  0xac   : > { %v425_v5 = vadd.f32 %v424_v61, %v423_v60  ;;  %v400_v17 = vpop.xlane.xlu0 %399 }
  0xad   : > { %v428_v19 = vsel %vm420_vm1, %v416_v10, 0.0  ;;  %v417_v22 = vmul.f32 %v409_v11, %v238_v16  ;;  %v410_v25 = vmul.f32 0.00390625, %v400_v17  ;;  %v241_v17 = vld [vmem:[%s937_s4] sm:$0x1] }
  0xae   : > { %v427_v18 = vadd.f32 %v426_v9, %v425_v5  ;;  %v403_v27 = vpop.xlane.xlu1 %402 }
  0xaf   : > { %v430_v31 = vsel %vm420_vm1, %v417_v22, 0.0  ;;  %v418_v32 = vmul.f32 %v410_v25, %v239_v26  ;;  %v411_v33 = vmul.f32 0.00390625, %v403_v27 }
  0xb0   : > { %v429_v30 = vadd.f32 %v428_v19, %v427_v18 }
  0xb1   : > { %v432_v36 = vsel %vm420_vm1, %v418_v32, 0.0  ;;  %v419_v37 = vmul.f32 %v411_v33, %v240_v34  ;;  %v529_v32 = vlaneseq }
  0xb2   : > { %v431_v35 = vadd.f32 %v430_v31, %v429_v30  ;;  %v266_v43 = vpop.permute.xlu1 %265 }
  0xb3   : > { %v434_v39 = vsel %vm420_vm1, %v419_v37, 0.0  ;;  %v530_v34 = vshrl.u32 %v529_v32, 7 }
  0xb4   : > { %v433_v38 = vadd.f32 %v432_v36, %v431_v35  ;;  %v261_v46 = vpop.permute.xlu0 %260 }
  0xb5   : > { %v531_v35 = vsub.s32 0, %v530_v34 }
  0xb6   : > { %v435_v40 = vadd.f32 %v434_v39, %v433_v38  ;;  %v271_v52 = vpop.permute.xlu1 %270 }
  0xb8   : > { %v436_v41 = vrot.slane %v435_v40, 4 }
  0xba   : > { %v437_v42 = vadd.f32 %v436_v41, %v435_v40  ;;  %v276_v60 = vpop.permute.xlu1 %275 }
  0xbc   : > { %v438_v47 = vrot.slane %v437_v42, 2 }
  0xbe   : > { %v439_v56 = vadd.f32 %v438_v47, %v437_v42 }
  0xc0   : > { %v440_v62 = vrot.slane %v439_v56, 1 }
  0xc2   : > { %v441_v16 = vadd.f32 %v440_v62, %v439_v56 }
  0xc4   : > { %v442_v18 = vadd.f32 %v441_v16, %v241_v17 }
  0xf6   : > { %v357_v44 = vpop.f32.mrb[0].mxu0 }
  0xf7   : > { %v359_v45 = vpop.f32.mrb[1].mxu0  ;;  %v358_v49 = vadd.f32 %v357_v44, %v261_v46 }
  0xf8   : > { %v360_v53 = vadd.f32 %v359_v45, %v261_v46 }
  0xfa   : > { %v363_v48 = vpop.f32.mrb[2].mxu0 }
  0xfb   : > { %v364_v50 = vadd.f32 %v363_v48, %v266_v43  ;;  %v365_v51 = vpop.f32.mrb[3].mxu0 }
  0xfc   : > { %v366_v54 = vadd.f32 %v365_v51, %v266_v43 }
  0xfd   : > { %v662_v55 = vpack.c.bf16 %v364_v50, %v358_v49 }
  0xfe   : > { %v369_v57 = vpop.f32.mrb[4].mxu0  ;;  %v660_v58 = vpack.c.bf16 %v366_v54, %v360_v53 }
  0xff   : > { %v371_v59 = vpop.f32.mrb[5].mxu0  ;;  %v370_v63 = vadd.f32 %v369_v57, %v271_v52 }
 0x100   : > { %661 = vmatprep.subr.bf16.mxu1 %v660_v58  ;;  %v372_v5 = vadd.f32 %v371_v59, %v271_v52 }
 0x101   : > { %663 = vmatpush1.bf16.msra.mxu1 %v662_v55 }
 0x102   : > { %v375_v61 = vpop.f32.mrb[6].mxu0 }
 0x103   : > { %v376_v0 = vadd.f32 %v375_v61, %v276_v60  ;;  %v377_v1 = vpop.f32.mrb[7].mxu0 }
 0x104   : > { %v378_v9 = vadd.f32 %v377_v1, %v276_v60 }
 0x105   : > { %v666_v10 = vpack.c.bf16 %v376_v0, %v370_v63 }
 0x106   : > { %v664_v11 = vpack.c.bf16 %v378_v9, %v372_v5 }
 0x108   : > { %665 = vmatprep.subr.bf16.mxu1 %v664_v11 }
 0x109   : > { %667 = vmatpush1.bf16.msra.mxu1 %v666_v10 }
 0x10c   : > { %637 = vmatmul.mubr.msk.f32.vlgmr.msra.gmra.mrb[0].mxu1 %vm420_vm1, %v442_v18 }
 0x1df   : > { %v512_v19 = vpop.f32.mrb[0].mxu1 }
 0x1e0   : > { %v638_v22 = vmul.f32 -1.442695, %v512_v19  ;;  %v514_v25 = vpop.f32.mrb[1].mxu1 }
 0x1e1   : > { %v639_v26 = vmul.f32 -1.442695, %v514_v25 }
 0x1e2   : > { %680 = vpow2.f32 %v638_v22 }
 0x1e3   : > { %682 = vpow2.f32 %v639_v26 }
 0x1ec   : > { %v681_v27 = vpop.eup %680 }
 0x1ed   : > { %v683_v30 = vpop.eup %682  ;;  %v523_v31 = vadd.f32 1.0, %v681_v27 }
 0x1ee   : > { %v524_v33 = vadd.f32 1.0, %v683_v30 }
 0x1ef   : > { %684 = vrcp.f32 %v523_v31 }
 0x1f0   : > { %686 = vrcp.f32 %v524_v33 }
 0x1f9   : > { %v685_v36 = vpop.eup %684 }
 0x1fa   : > { %v687_v37 = vpop.eup %686  ;;  %v532_v38 = vrot.slane %v685_v36, %v531_v35 }
 0x1fb   : > { %v536_v39 = vrot.slane %v687_v37, %v531_v35 }
 0x1fc   : > { %v537_v40 = vmul.f32 %v532_v38, %v755_v4  ;;  %v539_v41 = vmul.f32 %v532_v38, %v760_v6  ;;  %v541_v42 = vmul.f32 %v532_v38, %v775_v12  ;;  %v543_v43 = vmul.f32 %v532_v38, %v778_v13 }
 0x1fd   : > { %v545_v44 = vmul.f32 %v532_v38, %v795_v20  ;;  %v547_v45 = vmul.f32 %v532_v38, %v798_v21  ;;  %v549_v46 = vmul.f32 %v532_v38, %v815_v28  ;;  %v551_v47 = vmul.f32 %v532_v38, %v818_v29 }
 0x1fe   : > { %553 = vst [vmem:[%s896_s13] sm:$0xff] %v537_v40  ;;  %555 = vst [vmem:[%s896_s13 + $0x10] sm:$0xff] %v539_v41  ;;  %v538_v4 = vmul.f32 %v536_v39, %v749_v2  ;;  %v540_v6 = vmul.f32 %v536_v39, %v752_v3  ;;  %v542_v12 = vmul.f32 %v536_v39, %v763_v7 }
 0x1ff   : > { %557 = vst [vmem:[%s896_s13 + $0x20] sm:$0xff] %v541_v42  ;;  %559 = vst [vmem:[%s896_s13 + $0x30] sm:$0xff] %v543_v43  ;;  %v544_v13 = vmul.f32 %v536_v39, %v766_v8  ;;  %v546_v20 = vmul.f32 %v536_v39, %v781_v14  ;;  %v548_v21 = vmul.f32 %v536_v39, %v784_v15 }
 0x200   : > { %561 = vst [vmem:[%s896_s13 + $0x40] sm:$0xff] %v545_v44  ;;  %563 = vst [vmem:[%s896_s13 + $0x50] sm:$0xff] %v547_v45  ;;  %v550_v2 = vmul.f32 %v536_v39, %v803_v23  ;;  %v552_v28 = vmul.f32 %v536_v39, %v806_v24 }
 0x201   : > { %565 = vst [vmem:[%s896_s13 + $0x60] sm:$0xff] %v549_v46  ;;  %567 = vst [vmem:[%s896_s13 + $0x70] sm:$0xff] %v551_v47 }
 0x202   : > { %554 = vst [vmem:[%s896_s13 + $0x8] sm:$0xff] %v538_v4  ;;  %556 = vst [vmem:[%s896_s13 + $0x18] sm:$0xff] %v540_v6 }
 0x203   : > { %558 = vst [vmem:[%s896_s13 + $0x28] sm:$0xff] %v542_v12  ;;  %560 = vst [vmem:[%s896_s13 + $0x38] sm:$0xff] %v544_v13 }
 0x204   : > { %562 = vst [vmem:[%s896_s13 + $0x48] sm:$0xff] %v546_v20  ;;  %564 = vst [vmem:[%s896_s13 + $0x58] sm:$0xff] %v548_v21 }
 0x205   : > { %566 = vst [vmem:[%s896_s13 + $0x68] sm:$0xff] %v550_v2  ;;  %568 = vst [vmem:[%s896_s13 + $0x78] sm:$0xff] %v552_v28 }
 0x206 PF: > { %s15_s18 = sadd.s32 1, %s694_s18  }
 0x207   : > { %p12_p4 = scmp.ge.s32.totalorder %s15_s18, 4  }
 0x209   :  { %14 = sbr.rel (!%p12_p4) target bundleno = 1 (0x1), region = 70 }

</bundles_post_ra>
